<compile_context>
chip_gen: v7x
topology: tpu7x:2x2x1
jax: 0.10.0
libtpu: 0.0.40
codegen_flags: <defaults>
</compile_context>

<pallas_src>
import functools

import numpy as np

import jax
import jax.numpy as jnp
from jax.experimental import pallas as pl
from jax.experimental.pallas import tpu as pltpu


# --------------------------------------------------------------------------- #
# helpers
# --------------------------------------------------------------------------- #

def _shift(a, s):
    """out[..., p] = a[..., (p + s) % n] for a *static* shift (any sign).

    Lowers to a single XLU lane rotation (pltpu.roll with jnp.roll semantics:
    roll(a, k)[p] = a[(p - k) % n], so we roll by n - s)."""
    n = a.shape[-1]
    s = s % n
    if s == 0:
        return a
    return pltpu.roll(a, n - s, a.ndim - 1)


def _pack_conv_weights(w_hwio, cin_pad, dtype):
    """HWIO (3,3,cin,cout) -> (cout, 9*cin_pad); column (kh*3+kw)*cin_pad + c.
    Channels are zero-padded to cin_pad so tap blocks are 8-row aligned."""
    kh, kw, cin, cout = w_hwio.shape
    wt = jnp.transpose(w_hwio, (3, 0, 1, 2))                     # (cout, 3, 3, cin)
    if cin_pad > cin:
        wt = jnp.pad(wt, ((0, 0), (0, 0), (0, 0), (0, cin_pad - cin)))
    return wt.reshape(cout, kh * kw * cin_pad).astype(dtype)


def _interior_mask(hp, wp, p128, b_tile):
    """(1, b_tile*p128) f32: 1.0 on interior pixels of the padded pooled image,
    0.0 on the pad ring and on the lane-padding tail of every image slot."""
    m2 = np.zeros((hp + 2, wp + 2), np.float32)
    m2[1:-1, 1:-1] = 1.0
    m = np.zeros((p128,), np.float32)
    m[: (hp + 2) * (wp + 2)] = m2.reshape(-1)
    return np.tile(m, b_tile)[None, :]


# --------------------------------------------------------------------------- #
# fused kernel: 2x2 max-pool -> conv3x3+ReLU -> conv3x3+ReLU   (B_TILE images)
# --------------------------------------------------------------------------- #

def _vgg_down_kernel(x_ev_ref, x_od_ref, m_ref, w1_ref, b1_ref, w2_ref, b2_ref,
                     o_ref, a_ref, *, hp, wp, wp2, p128, b_tile, cin, cout2,
                     mxu_dtype):
    # x_ev_ref / x_od_ref : (b_tile*cin, H*Wp)  even / odd input columns (f32)
    # m_ref               : (1, b_tile*p128)    interior mask              (resident)
    # w1_ref              : (cout1, 9*cin_pad)  conv1 im2col weights       (resident)
    # w2_ref              : (cout2, 9*cout1)    conv2 im2col weights       (resident)
    # b1_ref / b2_ref     : (cout, 1) f32 biases                           (resident)
    # o_ref               : (b_tile*cout2, p128) padded-layout output (lane-dense)
    # a_ref               : VMEM scratch (cin_pad, b_tile*p128) f32 -- padded pooled acts
    shifts = [(kh - 1) * wp2 + (kw - 1) for kh in range(3) for kw in range(3)]

    # ---- fused 2x2 max-pool (f32) -------------------------------------------
    # horizontal pair-max is element-wise (wrapper supplies even/odd columns),
    # vertical pair-max pairs row 2i with row 2i+1 via one XLU lane roll by wp.
    xh = jnp.maximum(x_ev_ref[...], x_od_ref[...])        # (b_tile*cin, H*Wp)
    xv = jnp.maximum(xh, _shift(xh, wp))                  # rows 2i now hold the 2x2 max

    # scatter the kept rows into the zero-padded, lane-padded conv layout.
    a_ref[...] = jnp.zeros_like(a_ref)                    # zero ring + zero channel pad
    for b in range(b_tile):
        for i in range(hp):
            src = 2 * i * wp
            dst = b * p128 + (i + 1) * wp2 + 1
            a_ref[0:cin, dst:dst + wp] = xv[b * cin:(b + 1) * cin, src:src + wp]

    # ---- conv1 (3x3, pad=1): im2col via XLU rolls, one MXU matmul ------------
    a = a_ref[...]                                        # (cin_pad, b_tile*p128) f32
    p1 = jnp.concatenate([_shift(a, s) for s in shifts],
                         axis=0).astype(mxu_dtype)        # (9*cin_pad, L)
    y1 = jnp.dot(w1_ref[...], p1, preferred_element_type=jnp.float32)
    # bias + ReLU in f32, then re-zero the pad ring / lane tail (conv2 padding,
    # and it neutralizes the circular-wrap garbage of the rolls).
    y1 = jnp.maximum(y1 + b1_ref[...], 0.0) * m_ref[...]

    # ---- conv2 (3x3, pad=1) ---------------------------------------------------
    p2 = jnp.concatenate([_shift(y1, s) for s in shifts],
                         axis=0).astype(mxu_dtype)        # (9*cout1, L)
    y2 = jnp.dot(w2_ref[...], p2, preferred_element_type=jnp.float32)
    y2 = jnp.maximum(y2 + b2_ref[...], 0.0)

    # ---- lane-dense (128-wide, unmasked) stores in padded layout --------------
    for b in range(b_tile):
        o_ref[b * cout2:(b + 1) * cout2, :] = (
            y2[:, b * p128:(b + 1) * p128].astype(o_ref.dtype))


# --------------------------------------------------------------------------- #
# public wrapper (NCHW in, NCHW out -- same semantics as the PyTorch module)
# --------------------------------------------------------------------------- #

def vgg_down_forward(x_nchw, params, *, mxu_dtype=jnp.float32, b_tile=None):
    """VGGDown.forward: MaxPool2d(2) -> Conv3x3+ReLU -> Conv3x3+ReLU."""
    n, cin, h, w = x_nchw.shape
    out_dtype = x_nchw.dtype

    # PyTorch MaxPool2d(2) floor semantics: crop a trailing odd row / column.
    h2, w2 = (h // 2) * 2, (w // 2) * 2
    if (h2, w2) != (h, w):
        x_nchw = x_nchw[:, :, :h2, :w2]
    hp, wp = h2 // 2, w2 // 2
    wp2 = wp + 2
    p_img = (hp + 2) * wp2                     # padded pooled image, flattened
    p128 = pl.cdiv(p_img, 128) * 128           # lane-pad each image slot to x128

    cout1 = params["w1"].shape[-1]
    cout2 = params["w2"].shape[-1]
    cin_pad = max(8, ((cin + 7) // 8) * 8)     # 8-row aligned tap blocks

    if b_tile is None:                         # images packed per grid step (lanes)
        b_tile = next(b for b in (8, 4, 2, 1) if n % b == 0)

    # Wrapper layout plumbing (one fused XLA slice pass): even / odd input columns,
    # flattened (rows, Wp) on lanes.  All max-pool arithmetic happens in-kernel.
    x_ev = x_nchw[..., 0::2].reshape(n * cin, h2 * wp).astype(jnp.float32)
    x_od = x_nchw[..., 1::2].reshape(n * cin, h2 * wp).astype(jnp.float32)

    mask = jnp.asarray(_interior_mask(hp, wp, p128, b_tile))       # (1, b_tile*p128)
    w1m = _pack_conv_weights(params["w1"], cin_pad, mxu_dtype)     # (cout1, 9*cin_pad)
    w2m = _pack_conv_weights(params["w2"], cout1, mxu_dtype)       # (cout2, 9*cout1)
    b1 = params["b1"].reshape(cout1, 1).astype(jnp.float32)
    b2 = params["b2"].reshape(cout2, 1).astype(jnp.float32)

    kernel = functools.partial(
        _vgg_down_kernel, hp=hp, wp=wp, wp2=wp2, p128=p128, b_tile=b_tile,
        cin=cin, cout2=cout2, mxu_dtype=mxu_dtype)
    const = lambda i: (0, 0)   # resident blocks (weights / mask / biases)

    out_pad = pl.pallas_call(
        kernel,
        out_shape=jax.ShapeDtypeStruct((n * cout2, p128), out_dtype),
        grid=(n // b_tile,),
        in_specs=[
            pl.BlockSpec((b_tile * cin, h2 * wp), lambda i: (i, 0)),
            pl.BlockSpec((b_tile * cin, h2 * wp), lambda i: (i, 0)),
            pl.BlockSpec(mask.shape, const),
            pl.BlockSpec(w1m.shape, const),
            pl.BlockSpec(b1.shape, const),
            pl.BlockSpec(w2m.shape, const),
            pl.BlockSpec(b2.shape, const),
        ],
        out_specs=pl.BlockSpec((b_tile * cout2, p128), lambda i: (i, 0)),
        scratch_shapes=[
            pltpu.VMEM((cin_pad, b_tile * p128), jnp.float32),  # padded pooled acts
        ],
        compiler_params=pltpu.CompilerParams(
            dimension_semantics=("parallel",)),
    )(x_ev, x_od, mask, w1m, b1, w2m, b2)

    # Free wrapper crops: drop the lane-padding tail and the conv pad ring.
    out = out_pad.reshape(n, cout2, p128)[:, :, :p_img]
    out = out.reshape(n, cout2, hp + 2, wp2)[:, :, 1:-1, 1:-1]
    return out


# --------------------------------------------------------------------------- #
# pure-JAX reference
# --------------------------------------------------------------------------- #

def _conv_ref(x_nchw, w_hwio, b):
    y = jax.lax.conv_general_dilated(
        x_nchw, w_hwio, window_strides=(1, 1), padding=((1, 1), (1, 1)),
        dimension_numbers=("NCHW", "HWIO", "NCHW"))
    return jnp.maximum(y + b.reshape(1, -1, 1, 1), 0.0)


def vgg_down_reference(x_nchw, params):
    x = jax.lax.reduce_window(
        x_nchw, -jnp.inf, jax.lax.max,
        window_dimensions=(1, 1, 2, 2), window_strides=(1, 1, 2, 2),
        padding="VALID")
    x = _conv_ref(x, params["w1"], params["b1"])
    x = _conv_ref(x, params["w2"], params["b2"])
    return x


# --------------------------------------------------------------------------- #
# main
# --------------------------------------------------------------------------- #

if __name__ == "__main__":
    key = jax.random.PRNGKey(0)
    k1, k2, k3, k4, kx = jax.random.split(key, 5)

    N, CIN, H, W = 2, 4, 16, 16     # input (NCHW)
    COUT = 8                        # vgg_block output channels

    params = {
        "w1": jax.random.normal(k1, (3, 3, CIN, COUT), jnp.float32) * 0.1,
        "b1": jax.random.normal(k2, (COUT,), jnp.float32) * 0.1,
        "w2": jax.random.normal(k3, (3, 3, COUT, COUT), jnp.float32) * 0.1,
        "b2": jax.random.normal(k4, (COUT,), jnp.float32) * 0.1,
    }
    x = jax.random.normal(kx, (N, CIN, H, W), jnp.float32)

    ref = jax.block_until_ready(vgg_down_reference(x, params))

    # f32 MXU path (exact up to summation order)
    out = jax.block_until_ready(vgg_down_forward(x, params))
    assert out.shape == (N, COUT, H // 2, W // 2), out.shape
    err = float(jnp.max(jnp.abs(out - ref)))
    assert err < 1e-4, f"f32 max abs error too large: {err}"

    # bf16 MXU-input path (f32 pool, f32 accumulation, f32 epilogue)
    out_bf16 = jax.block_until_ready(
        vgg_down_forward(x, params, mxu_dtype=jnp.bfloat16))
    err_bf16 = float(jnp.max(jnp.abs(out_bf16 - ref)))
    assert err_bf16 < 5e-2, f"bf16 max abs error too large: {err_bf16}"

    print("KERNEL_OK")
</pallas_src>

<mosaic_0001>
module attributes {stable_mosaic.version = 11 : i64} {
  func.func @_vgg_down_kernel(%arg0: i32, %arg1: memref<8x128xf32, #tpu.memory_space<vmem>>, %arg2: memref<8x128xf32, #tpu.memory_space<vmem>>, %arg3: memref<1x256xf32, #tpu.memory_space<vmem>>, %arg4: memref<8x72xf32, #tpu.memory_space<vmem>>, %arg5: memref<8x1xf32, #tpu.memory_space<vmem>>, %arg6: memref<8x72xf32, #tpu.memory_space<vmem>>, %arg7: memref<8x1xf32, #tpu.memory_space<vmem>>, %arg8: memref<16x128xf32, #tpu.memory_space<vmem>>, %arg9: memref<8x256xf32, #tpu.memory_space<vmem>>) attributes {dimension_semantics = [#tpu.dimension_semantics<parallel>], iteration_bounds = array<i64: 1>, scalar_prefetch = 0 : i64, scratch_operands = 1 : i64, tpu.core_type = #tpu.core_type<tc>, window_params = [{transform_indices = @transform_0, window_bounds = array<i64: 8, 128>}, {transform_indices = @transform_1, window_bounds = array<i64: 8, 128>}, {pipeline_mode = #tpu.pipeline_mode<synchronous>, transform_indices = @transform_2, window_bounds = array<i64: 1, 256>}, {pipeline_mode = #tpu.pipeline_mode<synchronous>, transform_indices = @transform_3, window_bounds = array<i64: 8, 72>}, {pipeline_mode = #tpu.pipeline_mode<synchronous>, transform_indices = @transform_4, window_bounds = array<i64: 8, 1>}, {pipeline_mode = #tpu.pipeline_mode<synchronous>, transform_indices = @transform_5, window_bounds = array<i64: 8, 72>}, {pipeline_mode = #tpu.pipeline_mode<synchronous>, transform_indices = @transform_6, window_bounds = array<i64: 8, 1>}, {transform_indices = @transform_7, window_bounds = array<i64: 16, 128>}]} {
    %c0 = arith.constant 0 : index
    %c0_0 = arith.constant 0 : index
    %0 = vector.load %arg1[%c0, %c0_0] : memref<8x128xf32, #tpu.memory_space<vmem>>, vector<8x128xf32>
    %c0_1 = arith.constant 0 : index
    %c0_2 = arith.constant 0 : index
    %1 = vector.load %arg2[%c0_1, %c0_2] : memref<8x128xf32, #tpu.memory_space<vmem>>, vector<8x128xf32>
    %2 = arith.maximumf %0, %1 : vector<8x128xf32>
    %c120_i32 = arith.constant 120 : i32
    %3 = tpu.dynamic_rotate %2 by %c120_i32 dim 1 : vector<8x128xf32>, i32 -> vector<8x128xf32>
    %4 = arith.maximumf %2, %3 : vector<8x128xf32>
    %cst = arith.constant 0.000000e+00 : f32
    %5 = vector.broadcast %cst : f32 to vector<8x256xf32>
    %c0_3 = arith.constant 0 : index
    %c0_4 = arith.constant 0 : index
    %6 = vector.load %arg9[%c0_3, %c0_4] : memref<8x256xf32, #tpu.memory_space<vmem>>, vector<8x256xf32>
    tpu.vector_store %arg9[%c0_3, %c0_4], %5 {strides = array<i32>} : memref<8x256xf32, #tpu.memory_space<vmem>>, vector<8x256xf32>,
    %7 = vector.extract_strided_slice %4 {offsets = [0, 0], sizes = [4, 8], strides = [1, 1]} : vector<8x128xf32> to vector<4x8xf32>
    %c0_5 = arith.constant 0 : index
    %c11 = arith.constant 11 : index
    %8 = vector.load %arg9[%c0_5, %c11] : memref<8x256xf32, #tpu.memory_space<vmem>>, vector<4x8xf32>
    tpu.vector_store %arg9[%c0_5, %c11], %7 {strides = array<i32>} : memref<8x256xf32, #tpu.memory_space<vmem>>, vector<4x8xf32>,
    %9 = vector.extract_strided_slice %4 {offsets = [0, 16], sizes = [4, 8], strides = [1, 1]} : vector<8x128xf32> to vector<4x8xf32>
    %c0_6 = arith.constant 0 : index
    %c21 = arith.constant 21 : index
    %10 = vector.load %arg9[%c0_6, %c21] : memref<8x256xf32, #tpu.memory_space<vmem>>, vector<4x8xf32>
    tpu.vector_store %arg9[%c0_6, %c21], %9 {strides = array<i32>} : memref<8x256xf32, #tpu.memory_space<vmem>>, vector<4x8xf32>,
    %11 = vector.extract_strided_slice %4 {offsets = [0, 32], sizes = [4, 8], strides = [1, 1]} : vector<8x128xf32> to vector<4x8xf32>
    %c0_7 = arith.constant 0 : index
    %c31 = arith.constant 31 : index
    %12 = vector.load %arg9[%c0_7, %c31] : memref<8x256xf32, #tpu.memory_space<vmem>>, vector<4x8xf32>
    tpu.vector_store %arg9[%c0_7, %c31], %11 {strides = array<i32>} : memref<8x256xf32, #tpu.memory_space<vmem>>, vector<4x8xf32>,
    %13 = vector.extract_strided_slice %4 {offsets = [0, 48], sizes = [4, 8], strides = [1, 1]} : vector<8x128xf32> to vector<4x8xf32>
    %c0_8 = arith.constant 0 : index
    %c41 = arith.constant 41 : index
    %14 = vector.load %arg9[%c0_8, %c41] : memref<8x256xf32, #tpu.memory_space<vmem>>, vector<4x8xf32>
    tpu.vector_store %arg9[%c0_8, %c41], %13 {strides = array<i32>} : memref<8x256xf32, #tpu.memory_space<vmem>>, vector<4x8xf32>,
    %15 = vector.extract_strided_slice %4 {offsets = [0, 64], sizes = [4, 8], strides = [1, 1]} : vector<8x128xf32> to vector<4x8xf32>
    %c0_9 = arith.constant 0 : index
    %c51 = arith.constant 51 : index
    %16 = vector.load %arg9[%c0_9, %c51] : memref<8x256xf32, #tpu.memory_space<vmem>>, vector<4x8xf32>
    tpu.vector_store %arg9[%c0_9, %c51], %15 {strides = array<i32>} : memref<8x256xf32, #tpu.memory_space<vmem>>, vector<4x8xf32>,
    %17 = vector.extract_strided_slice %4 {offsets = [0, 80], sizes = [4, 8], strides = [1, 1]} : vector<8x128xf32> to vector<4x8xf32>
    %c0_10 = arith.constant 0 : index
    %c61 = arith.constant 61 : index
    %18 = vector.load %arg9[%c0_10, %c61] : memref<8x256xf32, #tpu.memory_space<vmem>>, vector<4x8xf32>
    tpu.vector_store %arg9[%c0_10, %c61], %17 {strides = array<i32>} : memref<8x256xf32, #tpu.memory_space<vmem>>, vector<4x8xf32>,
    %19 = vector.extract_strided_slice %4 {offsets = [0, 96], sizes = [4, 8], strides = [1, 1]} : vector<8x128xf32> to vector<4x8xf32>
    %c0_11 = arith.constant 0 : index
    %c71 = arith.constant 71 : index
    %20 = vector.load %arg9[%c0_11, %c71] : memref<8x256xf32, #tpu.memory_space<vmem>>, vector<4x8xf32>
    tpu.vector_store %arg9[%c0_11, %c71], %19 {strides = array<i32>} : memref<8x256xf32, #tpu.memory_space<vmem>>, vector<4x8xf32>,
    %21 = vector.extract_strided_slice %4 {offsets = [0, 112], sizes = [4, 8], strides = [1, 1]} : vector<8x128xf32> to vector<4x8xf32>
    %c0_12 = arith.constant 0 : index
    %c81 = arith.constant 81 : index
    %22 = vector.load %arg9[%c0_12, %c81] : memref<8x256xf32, #tpu.memory_space<vmem>>, vector<4x8xf32>
    tpu.vector_store %arg9[%c0_12, %c81], %21 {strides = array<i32>} : memref<8x256xf32, #tpu.memory_space<vmem>>, vector<4x8xf32>,
    %23 = vector.extract_strided_slice %4 {offsets = [4, 0], sizes = [4, 8], strides = [1, 1]} : vector<8x128xf32> to vector<4x8xf32>
    %c0_13 = arith.constant 0 : index
    %c139 = arith.constant 139 : index
    %24 = vector.load %arg9[%c0_13, %c139] : memref<8x256xf32, #tpu.memory_space<vmem>>, vector<4x8xf32>
    tpu.vector_store %arg9[%c0_13, %c139], %23 {strides = array<i32>} : memref<8x256xf32, #tpu.memory_space<vmem>>, vector<4x8xf32>,
    %25 = vector.extract_strided_slice %4 {offsets = [4, 16], sizes = [4, 8], strides = [1, 1]} : vector<8x128xf32> to vector<4x8xf32>
    %c0_14 = arith.constant 0 : index
    %c149 = arith.constant 149 : index
    %26 = vector.load %arg9[%c0_14, %c149] : memref<8x256xf32, #tpu.memory_space<vmem>>, vector<4x8xf32>
    tpu.vector_store %arg9[%c0_14, %c149], %25 {strides = array<i32>} : memref<8x256xf32, #tpu.memory_space<vmem>>, vector<4x8xf32>,
    %27 = vector.extract_strided_slice %4 {offsets = [4, 32], sizes = [4, 8], strides = [1, 1]} : vector<8x128xf32> to vector<4x8xf32>
    %c0_15 = arith.constant 0 : index
    %c159 = arith.constant 159 : index
    %28 = vector.load %arg9[%c0_15, %c159] : memref<8x256xf32, #tpu.memory_space<vmem>>, vector<4x8xf32>
    tpu.vector_store %arg9[%c0_15, %c159], %27 {strides = array<i32>} : memref<8x256xf32, #tpu.memory_space<vmem>>, vector<4x8xf32>,
    %29 = vector.extract_strided_slice %4 {offsets = [4, 48], sizes = [4, 8], strides = [1, 1]} : vector<8x128xf32> to vector<4x8xf32>
    %c0_16 = arith.constant 0 : index
    %c169 = arith.constant 169 : index
    %30 = vector.load %arg9[%c0_16, %c169] : memref<8x256xf32, #tpu.memory_space<vmem>>, vector<4x8xf32>
    tpu.vector_store %arg9[%c0_16, %c169], %29 {strides = array<i32>} : memref<8x256xf32, #tpu.memory_space<vmem>>, vector<4x8xf32>,
    %31 = vector.extract_strided_slice %4 {offsets = [4, 64], sizes = [4, 8], strides = [1, 1]} : vector<8x128xf32> to vector<4x8xf32>
    %c0_17 = arith.constant 0 : index
    %c179 = arith.constant 179 : index
    %32 = vector.load %arg9[%c0_17, %c179] : memref<8x256xf32, #tpu.memory_space<vmem>>, vector<4x8xf32>
    tpu.vector_store %arg9[%c0_17, %c179], %31 {strides = array<i32>} : memref<8x256xf32, #tpu.memory_space<vmem>>, vector<4x8xf32>,
    %33 = vector.extract_strided_slice %4 {offsets = [4, 80], sizes = [4, 8], strides = [1, 1]} : vector<8x128xf32> to vector<4x8xf32>
    %c0_18 = arith.constant 0 : index
    %c189 = arith.constant 189 : index
    %34 = vector.load %arg9[%c0_18, %c189] : memref<8x256xf32, #tpu.memory_space<vmem>>, vector<4x8xf32>
    tpu.vector_store %arg9[%c0_18, %c189], %33 {strides = array<i32>} : memref<8x256xf32, #tpu.memory_space<vmem>>, vector<4x8xf32>,
    %35 = vector.extract_strided_slice %4 {offsets = [4, 96], sizes = [4, 8], strides = [1, 1]} : vector<8x128xf32> to vector<4x8xf32>
    %c0_19 = arith.constant 0 : index
    %c199 = arith.constant 199 : index
    %36 = vector.load %arg9[%c0_19, %c199] : memref<8x256xf32, #tpu.memory_space<vmem>>, vector<4x8xf32>
    tpu.vector_store %arg9[%c0_19, %c199], %35 {strides = array<i32>} : memref<8x256xf32, #tpu.memory_space<vmem>>, vector<4x8xf32>,
    %37 = vector.extract_strided_slice %4 {offsets = [4, 112], sizes = [4, 8], strides = [1, 1]} : vector<8x128xf32> to vector<4x8xf32>
    %c0_20 = arith.constant 0 : index
    %c209 = arith.constant 209 : index
    %38 = vector.load %arg9[%c0_20, %c209] : memref<8x256xf32, #tpu.memory_space<vmem>>, vector<4x8xf32>
    tpu.vector_store %arg9[%c0_20, %c209], %37 {strides = array<i32>} : memref<8x256xf32, #tpu.memory_space<vmem>>, vector<4x8xf32>,
    %c0_21 = arith.constant 0 : index
    %c0_22 = arith.constant 0 : index
    %39 = vector.load %arg9[%c0_21, %c0_22] : memref<8x256xf32, #tpu.memory_space<vmem>>, vector<8x256xf32>
    %c11_i32 = arith.constant 11 : i32
    %40 = tpu.dynamic_rotate %39 by %c11_i32 dim 1 : vector<8x256xf32>, i32 -> vector<8x256xf32>
    %c10_i32 = arith.constant 10 : i32
    %41 = tpu.dynamic_rotate %39 by %c10_i32 dim 1 : vector<8x256xf32>, i32 -> vector<8x256xf32>
    %c9_i32 = arith.constant 9 : i32
    %42 = tpu.dynamic_rotate %39 by %c9_i32 dim 1 : vector<8x256xf32>, i32 -> vector<8x256xf32>
    %c1_i32 = arith.constant 1 : i32
    %43 = tpu.dynamic_rotate %39 by %c1_i32 dim 1 : vector<8x256xf32>, i32 -> vector<8x256xf32>
    %c255_i32 = arith.constant 255 : i32
    %44 = tpu.dynamic_rotate %39 by %c255_i32 dim 1 : vector<8x256xf32>, i32 -> vector<8x256xf32>
    %c247_i32 = arith.constant 247 : i32
    %45 = tpu.dynamic_rotate %39 by %c247_i32 dim 1 : vector<8x256xf32>, i32 -> vector<8x256xf32>
    %c246_i32 = arith.constant 246 : i32
    %46 = tpu.dynamic_rotate %39 by %c246_i32 dim 1 : vector<8x256xf32>, i32 -> vector<8x256xf32>
    %c245_i32 = arith.constant 245 : i32
    %47 = tpu.dynamic_rotate %39 by %c245_i32 dim 1 : vector<8x256xf32>, i32 -> vector<8x256xf32>
    %48 = tpu.concatenate %40, %41, %42, %43, %39, %44, %45, %46, %47 in 0 : vector<8x256xf32>, vector<8x256xf32>, vector<8x256xf32>, vector<8x256xf32>, vector<8x256xf32>, vector<8x256xf32>, vector<8x256xf32>, vector<8x256xf32>, vector<8x256xf32> -> vector<72x256xf32>
    %c0_23 = arith.constant 0 : index
    %c0_24 = arith.constant 0 : index
    %49 = vector.load %arg4[%c0_23, %c0_24] : memref<8x72xf32, #tpu.memory_space<vmem>>, vector<8x72xf32>
    %cst_25 = arith.constant dense<0.000000e+00> : vector<8x256xf32>
    %50 = tpu.matmul %49, %48, %cst_25 {dimension_numbers = #tpu.dot_dimension_numbers<[1], [0], [0], [1], [0, 0, 1, 1], [], []>} : vector<8x72xf32>, vector<72x256xf32>, vector<8x256xf32> -> vector<8x256xf32>
    %c0_26 = arith.constant 0 : index
    %c0_27 = arith.constant 0 : index
    %51 = vector.load %arg5[%c0_26, %c0_27] : memref<8x1xf32, #tpu.memory_space<vmem>>, vector<8x1xf32>
    %52 = vector.broadcast %51 : vector<8x1xf32> to vector<8x256xf32>
    %53 = arith.addf %50, %52 : vector<8x256xf32>
    %cst_28 = arith.constant 0.000000e+00 : f32
    %54 = vector.broadcast %cst_28 : f32 to vector<8x256xf32>
    %55 = arith.maximumf %53, %54 : vector<8x256xf32>
    %c0_29 = arith.constant 0 : index
    %c0_30 = arith.constant 0 : index
    %56 = vector.load %arg3[%c0_29, %c0_30] : memref<1x256xf32, #tpu.memory_space<vmem>>, vector<1x256xf32>
    %57 = vector.broadcast %56 : vector<1x256xf32> to vector<8x256xf32>
    %58 = arith.mulf %55, %57 : vector<8x256xf32>
    %c11_i32_31 = arith.constant 11 : i32
    %59 = tpu.dynamic_rotate %58 by %c11_i32_31 dim 1 : vector<8x256xf32>, i32 -> vector<8x256xf32>
    %c10_i32_32 = arith.constant 10 : i32
    %60 = tpu.dynamic_rotate %58 by %c10_i32_32 dim 1 : vector<8x256xf32>, i32 -> vector<8x256xf32>
    %c9_i32_33 = arith.constant 9 : i32
    %61 = tpu.dynamic_rotate %58 by %c9_i32_33 dim 1 : vector<8x256xf32>, i32 -> vector<8x256xf32>
    %c1_i32_34 = arith.constant 1 : i32
    %62 = tpu.dynamic_rotate %58 by %c1_i32_34 dim 1 : vector<8x256xf32>, i32 -> vector<8x256xf32>
    %c255_i32_35 = arith.constant 255 : i32
    %63 = tpu.dynamic_rotate %58 by %c255_i32_35 dim 1 : vector<8x256xf32>, i32 -> vector<8x256xf32>
    %c247_i32_36 = arith.constant 247 : i32
    %64 = tpu.dynamic_rotate %58 by %c247_i32_36 dim 1 : vector<8x256xf32>, i32 -> vector<8x256xf32>
    %c246_i32_37 = arith.constant 246 : i32
    %65 = tpu.dynamic_rotate %58 by %c246_i32_37 dim 1 : vector<8x256xf32>, i32 -> vector<8x256xf32>
    %c245_i32_38 = arith.constant 245 : i32
    %66 = tpu.dynamic_rotate %58 by %c245_i32_38 dim 1 : vector<8x256xf32>, i32 -> vector<8x256xf32>
    %67 = tpu.concatenate %59, %60, %61, %62, %58, %63, %64, %65, %66 in 0 : vector<8x256xf32>, vector<8x256xf32>, vector<8x256xf32>, vector<8x256xf32>, vector<8x256xf32>, vector<8x256xf32>, vector<8x256xf32>, vector<8x256xf32>, vector<8x256xf32> -> vector<72x256xf32>
    %c0_39 = arith.constant 0 : index
    %c0_40 = arith.constant 0 : index
    %68 = vector.load %arg6[%c0_39, %c0_40] : memref<8x72xf32, #tpu.memory_space<vmem>>, vector<8x72xf32>
    %cst_41 = arith.constant dense<0.000000e+00> : vector<8x256xf32>
    %69 = tpu.matmul %68, %67, %cst_41 {dimension_numbers = #tpu.dot_dimension_numbers<[1], [0], [0], [1], [0, 0, 1, 1], [], []>} : vector<8x72xf32>, vector<72x256xf32>, vector<8x256xf32> -> vector<8x256xf32>
    %c0_42 = arith.constant 0 : index
    %c0_43 = arith.constant 0 : index
    %70 = vector.load %arg7[%c0_42, %c0_43] : memref<8x1xf32, #tpu.memory_space<vmem>>, vector<8x1xf32>
    %71 = vector.broadcast %70 : vector<8x1xf32> to vector<8x256xf32>
    %72 = arith.addf %69, %71 : vector<8x256xf32>
    %cst_44 = arith.constant 0.000000e+00 : f32
    %73 = vector.broadcast %cst_44 : f32 to vector<8x256xf32>
    %74 = arith.maximumf %72, %73 : vector<8x256xf32>
    %75 = vector.extract_strided_slice %74 {offsets = [0, 0], sizes = [8, 128], strides = [1, 1]} : vector<8x256xf32> to vector<8x128xf32>
    %c0_45 = arith.constant 0 : index
    %c0_46 = arith.constant 0 : index
    %76 = vector.load %arg8[%c0_45, %c0_46] : memref<16x128xf32, #tpu.memory_space<vmem>>, vector<8x128xf32>
    tpu.vector_store %arg8[%c0_45, %c0_46], %75 {strides = array<i32>} : memref<16x128xf32, #tpu.memory_space<vmem>>, vector<8x128xf32>,
    %77 = vector.extract_strided_slice %74 {offsets = [0, 128], sizes = [8, 128], strides = [1, 1]} : vector<8x256xf32> to vector<8x128xf32>
    %c8 = arith.constant 8 : index
    %c0_47 = arith.constant 0 : index
    %78 = vector.load %arg8[%c8, %c0_47] : memref<16x128xf32, #tpu.memory_space<vmem>>, vector<8x128xf32>
    tpu.vector_store %arg8[%c8, %c0_47], %77 {strides = array<i32>} : memref<16x128xf32, #tpu.memory_space<vmem>>, vector<8x128xf32>,
    return
  }
  func.func @transform_0(%arg0: i32) -> (i32, i32) {
    %c0_i32 = arith.constant 0 : i32
    %c0_i32_0 = arith.constant 0 : i32
    return %arg0, %c0_i32 : i32, i32
  }
  func.func @transform_1(%arg0: i32) -> (i32, i32) {
    %c0_i32 = arith.constant 0 : i32
    %c0_i32_0 = arith.constant 0 : i32
    return %arg0, %c0_i32 : i32, i32
  }
  func.func @transform_2(%arg0: i32) -> (i32, i32) {
    %c0_i32 = arith.constant 0 : i32
    %c0_i32_0 = arith.constant 0 : i32
    %c0_i32_1 = arith.constant 0 : i32
    return %c0_i32, %c0_i32_0 : i32, i32
  }
  func.func @transform_3(%arg0: i32) -> (i32, i32) {
    %c0_i32 = arith.constant 0 : i32
    %c0_i32_0 = arith.constant 0 : i32
    %c0_i32_1 = arith.constant 0 : i32
    return %c0_i32, %c0_i32_0 : i32, i32
  }
  func.func @transform_4(%arg0: i32) -> (i32, i32) {
    %c0_i32 = arith.constant 0 : i32
    %c0_i32_0 = arith.constant 0 : i32
    %c0_i32_1 = arith.constant 0 : i32
    return %c0_i32, %c0_i32_0 : i32, i32
  }
  func.func @transform_5(%arg0: i32) -> (i32, i32) {
    %c0_i32 = arith.constant 0 : i32
    %c0_i32_0 = arith.constant 0 : i32
    %c0_i32_1 = arith.constant 0 : i32
    return %c0_i32, %c0_i32_0 : i32, i32
  }
  func.func @transform_6(%arg0: i32) -> (i32, i32) {
    %c0_i32 = arith.constant 0 : i32
    %c0_i32_0 = arith.constant 0 : i32
    %c0_i32_1 = arith.constant 0 : i32
    return %c0_i32, %c0_i32_0 : i32, i32
  }
  func.func @transform_7(%arg0: i32) -> (i32, i32) {
    %c0_i32 = arith.constant 0 : i32
    %c0_i32_0 = arith.constant 0 : i32
    return %arg0, %c0_i32 : i32, i32
  }
}

</mosaic_0001>

<bundles_post_ra>
// kernel: tpu_custom_call.1
= control target key start
LH: loop header
LB: loop body
LE: loop exit
PB: predicated region body
PF: predicated region fallthrough
CT: control target
= control target key end

     0   :  { %12 = vsyncpa [#allocation4], 0  ;;  %s827_s0 = inlined_call_operand.vmem [shape: f32[8,128], index: 0, kind: input, shape index: {}]   ;;  %s828_s1 = inlined_call_operand.vmem [shape: f32[8,128], index: 1, kind: input, shape index: {}]   ;;  %s829_s2 = inlined_call_operand.hbm [shape: f32[1,256], index: 2, kind: input, shape index: {}]   ;;  %s830_s3 = inlined_call_operand.vmem [shape: f32[8,72], index: 3, kind: input, shape index: {}]   ;;  %s831_s4 = inlined_call_operand.vmem [shape: f32[8,1], index: 4, kind: input, shape index: {}]   ;;  %s832_s5 = inlined_call_operand.vmem [shape: f32[8,72], index: 5, kind: input, shape index: {}]   ;;  %s833_s6 = inlined_call_operand.vmem [shape: f32[8,1], index: 6, kind: input, shape index: {}]   ;;  %s834_s7 = inlined_call_operand.hbm [shape: f32[16,128], index: 7, kind: output, shape index: {}]  }
   0x1   :  { %13 = vsyncpa [#allocation5], 0  ;;  %s604_s24 = smov [#allocation3]   ;;  %s556_s28 = scalar_lea.hbm %s829_s2, 32 }
   0x2   :  { %s24_s25 = sshll.u32 %s604_s24, 4  ;;  %p557_p0 = scmp.ne.s32.totalorder %s829_s2, %s556_s28  ;;  %s25_s25 = int_to_ptr.vmem [resolvable:$true] %s24_s25 }
   0x3   :  { %p560_p1 = scmp.lt.u32.totalorder %s556_s28, %s829_s2 }
   0x5   :  { %p562_p2 = pnand %p560_p1, %p557_p0 }
   0x7   :  { %565 = shalt.err (!%p562_p2)
}
   0x8   :  { %s566_s10 = scalar_lea.vmem %s25_s25, 32  ;;  %p571_p4 = scmp.lt.s32.totalorder %s25_s25, %s25_s25 }
   0x9   :  { %p567_p3 = scmp.ne.s32.totalorder %s25_s25, %s566_s10  ;;  %p572_p5 = scmp.lt.s32.totalorder %s566_s10, %s566_s10 }
   0xb   :  { %p573_p6 = por %p572_p5, %p571_p4 }
   0xd   :  { %p574_p7 = pnand %p573_p6, %p567_p3 }
   0xf   :  { %577 = shalt.err (!%p574_p7)
}
  0x10   :  { %27 = dma.hbm_to_vmem [thread:$0]  %s829_s2, 32, %s25_s25, [#allocation4]  }
  0x11   :  { %600 = dma.done.wait [#allocation4], 32  }
  0x12   :  { %601 = vsyncadd [#allocation4], 4294967264  ;;  %v39_v0 = vld [vmem:[%s827_s0] sm:$0xff]  ;;  %s605_s17 = smov 120   ;;  %v606_v3 = vmov 0.0   ;;  %s607_s2 = smov 5   ;;  %v127_v28 = vlaneseq }
  0x13   :  { %v40_v1 = vld [vmem:[%s828_s1] sm:$0xff]  ;;  %45 = vst [vmem:[#allocation2] sm:$0xff] %v606_v3  ;;  %46 = vst [vmem:[#allocation2 + $0x8] sm:$0xff] %v606_v3  ;;  %256 = vmatprep.mubr.f32.mxu0 %v606_v3  ;;  %401 = vmatprep.mubr.f32.mxu1 %v606_v3  ;;  %s608_s18 = smov 11   ;;  %s609_s0 = smov 127   ;;  %vm51_vm0 = vcmask 150616  }
  0x14   :  { %v41_v2 = vmax.f32 %v39_v0, %v40_v1  ;;  %s610_s1 = smov 121   ;;  %s611_s19 = smov 115   ;;  %vm56_vm1 = vcmask 232616   ;;  %vm61_vm2 = vcmask 314616   ;;  %vm66_vm3 = vcmask 396616   ;;  %v182_v27 = vld [vmem:[%s831_s4] sm:$0xff] }
  0x15   :  { %s612_s20 = smov 109   ;;  %s613_s21 = smov 103   ;;  %vm71_vm4 = vcmask 478616   ;;  %vm76_vm5 = vcmask 560616   ;;  %vm81_vm6 = vcmask 642616   ;;  %vm86_vm7 = vcmask 724616  }
  0x16   :  { %42 = vrot.lane.b32.xlu0 %v41_v2, %s605_s17  ;;  %s614_s22 = smov 97   ;;  %s615_s23 = smov 10   ;;  %v619_v26 = vmov 0   ;;  %v718_v29 = vand.u32 127, %v127_v28 }
  0x17   :  { %s616_s24 = smov 1   ;;  %s617_s25 = smov 9   ;;  %519 = vset.pattern.permute.xlu0 %v619_v26  ;;  %555 = vset.pattern.permute.xlu1 %v619_v26 }
  0x18   :  { %s618_s26 = smov 119   ;;  %s620_s27 = smov 117   ;;  %vm129_vm8 = vcmp.lt.s32.totalorder %v718_v29, 11  ;;  %vm136_vm9 = vcmp.lt.s32.totalorder %v718_v29, 10  ;;  %vm143_vm10 = vcmp.lt.s32.totalorder %v718_v29, 9  ;;  %vm150_vm11 = vcmp.lt.s32.totalorder %v718_v29, 1 }
  0x19   :  { %s621_s28 = smov 118   ;;  %vm157_vm12 = vcmp.lt.s32.totalorder %v718_v29, 127  ;;  %vm164_vm13 = vcmp.lt.s32.totalorder %v718_v29, 119  ;;  %vm171_vm14 = vcmp.lt.s32.totalorder %v718_v29, 118  ;;  %vm178_vm15 = vcmp.lt.s32.totalorder %v718_v29, 117  ;;  %s622_s11 = smov [#allocation6]  }
  0x1a   :  { %s417_s12 = sshll.u32 %s622_s11, 4  ;;  %s418_s12 = int_to_ptr.vmem [resolvable:$true] %s417_s12 }
  0x1b   :  { %s578_s13 = scalar_lea.vmem %s418_s12, 256  ;;  %p583_p9 = scmp.lt.s32.totalorder %s418_s12, %s418_s12 }
  0x1c   :  { %p579_p8 = scmp.ne.s32.totalorder %s418_s12, %s578_s13  ;;  %p584_p10 = scmp.lt.s32.totalorder %s578_s13, %s578_s13 }
  0x1e   :  { %p585_p11 = por %p584_p10, %p583_p9 }
  0x20   :  { %p586_p12 = pnand %p585_p11, %p579_p8 }
  0x88   :  { %v43_v4 = vpop.permute.xlu0 %42 }
  0x89   :  { %v44_v5 = vmax.f32 %v41_v2, %v43_v4 }
  0x8b   :  { %53 = vrot.lane.b32.xlu1 %v44_v5, %s607_s2  ;;  %48 = vrot.lane.b32.xlu0 %v44_v5, %s608_s18  ;;  %v88_v6 = vrot.slane %v44_v5, 4 }
  0x8f   :  { %58 = vrot.lane.b32.xlu1 %v44_v5, %s609_s0  ;;  %93 = vrot.lane.b32.xlu0 %v88_v6, %s607_s2 }
  0x93   :  { %63 = vrot.lane.b32.xlu1 %v44_v5, %s610_s1  ;;  %97 = vrot.lane.b32.xlu0 %v88_v6, %s609_s0 }
  0x97   :  { %68 = vrot.lane.b32.xlu1 %v44_v5, %s611_s19  ;;  %101 = vrot.lane.b32.xlu0 %v88_v6, %s610_s1 }
  0x9b   :  { %73 = vrot.lane.b32.xlu1 %v44_v5, %s612_s20  ;;  %105 = vrot.lane.b32.xlu0 %v88_v6, %s611_s19 }
  0x9f   :  { %109 = vrot.lane.b32.xlu0 %v88_v6, %s612_s20  ;;  %89 = vrot.lane.b32.xlu1 %v88_v6, %s608_s18 }
  0xa3   :  { %113 = vrot.lane.b32.xlu0 %v88_v6, %s613_s21  ;;  %78 = vrot.lane.b32.xlu1 %v44_v5, %s613_s21 }
  0xa7   :  { %117 = vrot.lane.b32.xlu0 %v88_v6, %s614_s22  ;;  %83 = vrot.lane.b32.xlu1 %v44_v5, %s614_s22 }
  0xfd   :  { %v54_v7 = vpop.permute.xlu1 %53  ;;  %v49_v8 = vpop.permute.xlu0 %48 }
  0xfe   :  { %52 = vst.msk [vmem:[#allocation2] sm:$0xf] %vm51_vm0, %v49_v8 }
  0xff   :  { %57 = vst.msk [vmem:[#allocation2] sm:$0xf] %vm56_vm1, %v54_v7 }
 0x101   :  { %v59_v9 = vpop.permute.xlu1 %58  ;;  %v94_v10 = vpop.permute.xlu0 %93 }
 0x102   :  { %62 = vst.msk [vmem:[#allocation2] sm:$0xf] %vm61_vm2, %v59_v9 }
 0x105   :  { %v64_v11 = vpop.permute.xlu1 %63  ;;  %v98_v12 = vpop.permute.xlu0 %97 }
 0x106   :  { %67 = vst.msk [vmem:[#allocation2] sm:$0xf] %vm66_vm3, %v64_v11 }
 0x109   :  { %v69_v13 = vpop.permute.xlu1 %68  ;;  %v102_v14 = vpop.permute.xlu0 %101 }
 0x10a   :  { %72 = vst.msk [vmem:[#allocation2] sm:$0xf] %vm71_vm4, %v69_v13 }
 0x10d   :  { %v74_v15 = vpop.permute.xlu1 %73  ;;  %v106_v16 = vpop.permute.xlu0 %105 }
 0x10e   :  { %77 = vst.msk [vmem:[#allocation2] sm:$0xf] %vm76_vm5, %v74_v15 }
 0x111   :  { %v110_v17 = vpop.permute.xlu0 %109  ;;  %v90_v18 = vpop.permute.xlu1 %89 }
 0x112   :  { %92 = vst.msk [vmem:[#allocation2 + $0x8] sm:$0xf] %vm51_vm0, %v90_v18  ;;  %vm188_vm0 = vcmask 588800  }
 0x113   :  { %96 = vst.msk [vmem:[#allocation2 + $0x8] sm:$0xf] %vm56_vm1, %v94_v10 }
 0x114   :  { %100 = vst.msk [vmem:[#allocation2 + $0x8] sm:$0xf] %vm61_vm2, %v98_v12  ;;  %v181_v12 = vld [vmem:[%s830_s3] sm:$0xff] }
 0x115   :  { %104 = vst.msk [vmem:[#allocation2 + $0x8] sm:$0xf] %vm66_vm3, %v102_v14  ;;  %v114_v19 = vpop.permute.xlu0 %113  ;;  %v79_v20 = vpop.permute.xlu1 %78  ;;  %v268_v14 = vshrl.u32 %v127_v28, 7  ;;  %v328_v28 = vld [vmem:[%s833_s6] sm:$0xff] }
 0x116   :  { %108 = vst.msk [vmem:[#allocation2 + $0x8] sm:$0xf] %vm71_vm4, %v106_v16 }
 0x117   :  { %82 = vst.msk [vmem:[#allocation2] sm:$0xf] %vm81_vm6, %v79_v20  ;;  %v269_v15 = vsub.s32 0, %v268_v14  ;;  %v273_v18 = vsub.s32 1, %v268_v14  ;;  %v327_v14 = vld [vmem:[%s832_s5] sm:$0xff] }
 0x118   :  { %112 = vst.msk [vmem:[#allocation2 + $0x8] sm:$0xf] %vm76_vm5, %v110_v17  ;;  %v265_v17 = vld [vmem:[#allocation3] sm:$0x3] }
 0x119   :  { %116 = vst.msk [vmem:[#allocation2 + $0x8] sm:$0xf] %vm81_vm6, %v114_v19  ;;  %v118_v21 = vpop.permute.xlu0 %117  ;;  %v84_v22 = vpop.permute.xlu1 %83 }
 0x11a   :  { %120 = vst.msk [vmem:[#allocation2 + $0x8] sm:$0xf] %vm86_vm7, %v118_v21  ;;  %87 = vst.msk [vmem:[#allocation2] sm:$0xf] %vm86_vm7, %v84_v22  ;;  %v270_v21 = vrot.slane %v265_v17, %v269_v15 }
 0x121   :  { %v697_v23 = vld [vmem:[#allocation2] sm:$0xff]  ;;  %v699_v24 = vld [vmem:[#allocation2 + $0x8] sm:$0xff] }
 0x122   :  { %v489_v25 = vpack.i.bf16 %v699_v24, %v697_v23 }
 0x124   :  { %490 = vrot.lane.b32.xlu0 %v489_v25, %s615_s23  ;;  %485 = vrot.lane.b32.xlu1 %v489_v25, %s608_s18 }
 0x128   :  { %500 = vrot.lane.b32.xlu0 %v489_v25, %s616_s24  ;;  %495 = vrot.lane.b32.xlu1 %v489_v25, %s617_s25 }
 0x12c   :  { %510 = vrot.lane.b32.xlu0 %v489_v25, %s618_s26  ;;  %505 = vrot.lane.b32.xlu1 %v489_v25, %s609_s0 }
 0x130   :  { %174 = vrot.lane.b32.xlu0 %v697_v23, %s620_s27  ;;  %515 = vrot.lane.b32.xlu1 %v489_v25, %s621_s28 }
 0x134   :  { %176 = vrot.lane.b32.xlu1 %v699_v24, %s620_s27  ;;  %185 = vperm.xlu0 %519, %v182_v27  }
 0x196   :  { %v491_v30 = vpop.permute.xlu0 %490  ;;  %v486_v31 = vpop.permute.xlu1 %485 }
 0x197   :  { %v493_v32 = vunpack.i.h.bf16 %v491_v30  ;;  %v492_v33 = vunpack.i.l.bf16 %v491_v30  ;;  %v488_v34 = vunpack.i.h.bf16 %v486_v31  ;;  %v487_v35 = vunpack.i.l.bf16 %v486_v31 }
 0x199   :  { %v130_v36 = vsel %vm129_vm8, %v487_v35, %v488_v34  ;;  %v137_v37 = vsel %vm136_vm9, %v492_v33, %v493_v32  ;;  %v131_v38 = vsel %vm129_vm8, %v488_v34, %v487_v35  ;;  %v138_v39 = vsel %vm136_vm9, %v493_v32, %v492_v33 }
 0x19a   :  { %v501_v40 = vpop.permute.xlu0 %500  ;;  %v496_v41 = vpop.permute.xlu1 %495  ;;  %v431_v42 = vpack.c.bf16 %v137_v37, %v130_v36  ;;  %v433_v43 = vpack.c.bf16 %v138_v39, %v131_v38 }
 0x19b   :  { %v503_v44 = vunpack.i.h.bf16 %v501_v40  ;;  %v502_v45 = vunpack.i.l.bf16 %v501_v40  ;;  %v498_v46 = vunpack.i.h.bf16 %v496_v41  ;;  %v497_v47 = vunpack.i.l.bf16 %v496_v41 }
 0x19c   :  { %432 = vmatprep.subr.bf16.mxu0 %v431_v42 }
 0x19d   :  { %434 = vmatpush1.bf16.msra.mxu0 %v433_v43  ;;  %v144_v48 = vsel %vm143_vm10, %v497_v47, %v498_v46  ;;  %v151_v49 = vsel %vm150_vm11, %v502_v45, %v503_v44  ;;  %v145_v50 = vsel %vm143_vm10, %v498_v46, %v497_v47  ;;  %v152_v51 = vsel %vm150_vm11, %v503_v44, %v502_v45 }
 0x19e   :  { %v511_v52 = vpop.permute.xlu0 %510  ;;  %v506_v53 = vpop.permute.xlu1 %505  ;;  %v435_v54 = vpack.c.bf16 %v151_v49, %v144_v48  ;;  %v437_v55 = vpack.c.bf16 %v152_v51, %v145_v50 }
 0x19f   :  { %v508_v56 = vunpack.i.h.bf16 %v506_v53  ;;  %v507_v57 = vunpack.i.l.bf16 %v506_v53  ;;  %v513_v58 = vunpack.i.h.bf16 %v511_v52  ;;  %v512_v59 = vunpack.i.l.bf16 %v511_v52 }
 0x1a0   :  { %436 = vmatprep.subr.bf16.mxu0 %v435_v54 }
 0x1a1   :  { %438 = vmatpush1.bf16.msra.mxu0 %v437_v55  ;;  %v159_v60 = vsel %vm157_vm12, %v508_v56, %v507_v57  ;;  %v158_v61 = vsel %vm157_vm12, %v507_v57, %v508_v56  ;;  %v166_v3 = vsel %vm164_vm13, %v513_v58, %v512_v59  ;;  %v165_v5 = vsel %vm164_vm13, %v512_v59, %v513_v58 }
 0x1a2   :  { %v516_v62 = vpop.permute.xlu1 %515  ;;  %v439_v63 = vpack.c.bf16 %v159_v60, %v699_v24  ;;  %v441_v0 = vpack.c.bf16 %v158_v61, %v697_v23  ;;  %v175_v10 = vpop.permute.xlu0 %174  ;;  %v274_v24 = vrot.slane %v265_v17, %v273_v18 }
 0x1a3   :  { %v518_v1 = vunpack.i.h.bf16 %v516_v62  ;;  %v517_v2 = vunpack.i.l.bf16 %v516_v62 }
 0x1a4   :  { %440 = vmatprep.subr.bf16.mxu0 %v439_v63 }
 0x1a5   :  { %442 = vmatpush1.bf16.msra.mxu0 %v441_v0  ;;  %v173_v4 = vsel %vm171_vm14, %v518_v1, %v517_v2  ;;  %v172_v6 = vsel %vm171_vm14, %v517_v2, %v518_v1 }
 0x1a6   :  { %v177_v7 = vpop.permute.xlu1 %176  ;;  %v443_v8 = vpack.c.bf16 %v173_v4, %v166_v3  ;;  %v445_v9 = vpack.c.bf16 %v172_v6, %v165_v5 }
 0x1a7   :  { %v180_v11 = vsel %vm178_vm15, %v177_v7, %v175_v10  ;;  %v179_v13 = vsel %vm178_vm15, %v175_v10, %v177_v7 }
 0x1a8   :  { %444 = vmatprep.subr.bf16.mxu0 %v443_v8 }
 0x1a9   :  { %446 = vmatpush1.bf16.msra.mxu0 %v445_v9 }
 0x1aa   :  { %208 = vmatprep.subr.mxu0 %v180_v11 }
 0x1ad   :  { %209 = vmatpush1.msra.mxu0 %v179_v13 }
 0x1ae   :  { %429 = vmatmul.mubr.msk.f32.vlgmr.msra.gmra.mrb[0].mxu0 %vm188_vm0, %v181_v12 }
 0x1b3   :  { %v186_v16 = vpop.permute.xlu0 %185 }
 0x281   :  { %v258_v19 = vpop.f32.mrb[0].mxu0 }
 0x282   :  { %v259_v20 = vadd.f32 %v258_v19, %v186_v16  ;;  %v260_v22 = vpop.f32.mrb[1].mxu0 }
 0x283   :  { %v261_v23 = vadd.f32 %v260_v22, %v186_v16 }
 0x284   :  { %v263_v25 = vmax.f32 %v259_v20, 0.0 }
 0x285   :  { %v264_v26 = vmax.f32 %v261_v23, 0.0 }
 0x286   :  { %v277_v27 = vmul.f32 %v270_v21, %v263_v25 }
 0x287   :  { %v278_v30 = vmul.f32 %v274_v24, %v264_v26 }
 0x289   :  { %v530_v31 = vpack.i.bf16 %v278_v30, %v277_v27 }
 0x28b   :  { %531 = vrot.lane.b32.xlu0 %v530_v31, %s617_s25  ;;  %521 = vrot.lane.b32.xlu1 %v530_v31, %s608_s18 }
 0x28f   :  { %541 = vrot.lane.b32.xlu0 %v530_v31, %s609_s0  ;;  %526 = vrot.lane.b32.xlu1 %v530_v31, %s615_s23 }
 0x293   :  { %551 = vrot.lane.b32.xlu0 %v530_v31, %s621_s28  ;;  %536 = vrot.lane.b32.xlu1 %v530_v31, %s616_s24 }
 0x297   :  { %323 = vrot.lane.b32.xlu0 %v278_v30, %s620_s27  ;;  %546 = vrot.lane.b32.xlu1 %v530_v31, %s618_s26 }
 0x29b   :  { %321 = vrot.lane.b32.xlu1 %v277_v27, %s620_s27 }
 0x29f   :  { %331 = vperm.xlu1 %555, %v328_v28  }
 0x2fd   :  { %v532_v32 = vpop.permute.xlu0 %531  ;;  %v522_v33 = vpop.permute.xlu1 %521 }
 0x2fe   :  { %v524_v34 = vunpack.i.h.bf16 %v522_v33  ;;  %v523_v35 = vunpack.i.l.bf16 %v522_v33  ;;  %v534_v40 = vunpack.i.h.bf16 %v532_v32  ;;  %v533_v41 = vunpack.i.l.bf16 %v532_v32 }
 0x300   :  { %v283_v42 = vsel %vm129_vm8, %v523_v35, %v524_v34  ;;  %v284_v43 = vsel %vm129_vm8, %v524_v34, %v523_v35  ;;  %v295_v54 = vsel %vm143_vm10, %v533_v41, %v534_v40  ;;  %v296_v56 = vsel %vm143_vm10, %v534_v40, %v533_v41 }
 0x301   :  { %v542_v36 = vpop.permute.xlu0 %541  ;;  %v527_v37 = vpop.permute.xlu1 %526 }
 0x302   :  { %v529_v38 = vunpack.i.h.bf16 %v527_v37  ;;  %v528_v39 = vunpack.i.l.bf16 %v527_v37  ;;  %v544_v44 = vunpack.i.h.bf16 %v542_v36  ;;  %v543_v45 = vunpack.i.l.bf16 %v542_v36 }
 0x304   :  { %v289_v46 = vsel %vm136_vm9, %v528_v39, %v529_v38  ;;  %v290_v47 = vsel %vm136_vm9, %v529_v38, %v528_v39  ;;  %v308_v58 = vsel %vm157_vm12, %v544_v44, %v543_v45  ;;  %v307_v3 = vsel %vm157_vm12, %v543_v45, %v544_v44 }
 0x305   :  { %v537_v48 = vpop.permute.xlu1 %536  ;;  %v447_v49 = vpack.c.bf16 %v289_v46, %v283_v42  ;;  %v449_v50 = vpack.c.bf16 %v290_v47, %v284_v43  ;;  %v552_v53 = vpop.permute.xlu0 %551  ;;  %v455_v2 = vpack.c.bf16 %v308_v58, %v278_v30  ;;  %v457_v5 = vpack.c.bf16 %v307_v3, %v277_v27 }
 0x306   :  { %v539_v51 = vunpack.i.h.bf16 %v537_v48  ;;  %v538_v52 = vunpack.i.l.bf16 %v537_v48  ;;  %v554_v62 = vunpack.i.h.bf16 %v552_v53  ;;  %v553_v63 = vunpack.i.l.bf16 %v552_v53 }
 0x307   :  { %448 = vmatprep.subr.bf16.mxu1 %v447_v49 }
 0x308   :  { %450 = vmatpush1.bf16.msra.mxu1 %v449_v50  ;;  %v301_v55 = vsel %vm150_vm11, %v538_v52, %v539_v51  ;;  %v302_v57 = vsel %vm150_vm11, %v539_v51, %v538_v52  ;;  %v320_v6 = vsel %vm171_vm14, %v554_v62, %v553_v63  ;;  %v319_v10 = vsel %vm171_vm14, %v553_v63, %v554_v62 }
 0x309   :  { %v547_v59 = vpop.permute.xlu1 %546  ;;  %v451_v60 = vpack.c.bf16 %v301_v55, %v295_v54  ;;  %v453_v61 = vpack.c.bf16 %v302_v57, %v296_v56  ;;  %v324_v12 = vpop.permute.xlu0 %323 }
 0x30a   :  { %v549_v0 = vunpack.i.h.bf16 %v547_v59  ;;  %v548_v1 = vunpack.i.l.bf16 %v547_v59 }
 0x30b   :  { %452 = vmatprep.subr.bf16.mxu1 %v451_v60 }
 0x30c   :  { %454 = vmatpush1.bf16.msra.mxu1 %v453_v61  ;;  %v314_v4 = vsel %vm164_vm13, %v549_v0, %v548_v1  ;;  %v313_v8 = vsel %vm164_vm13, %v548_v1, %v549_v0 }
 0x30d   :  { %456 = vmatprep.subr.bf16.mxu1 %v455_v2  ;;  %v459_v7 = vpack.c.bf16 %v320_v6, %v314_v4  ;;  %v322_v9 = vpop.permute.xlu1 %321  ;;  %v461_v11 = vpack.c.bf16 %v319_v10, %v313_v8 }
 0x30e   :  { %v326_v13 = vsel %vm178_vm15, %v324_v12, %v322_v9  ;;  %v325_v15 = vsel %vm178_vm15, %v322_v9, %v324_v12 }
 0x310   :  { %458 = vmatpush1.bf16.msra.mxu1 %v457_v5 }
 0x311   :  { %460 = vmatprep.subr.bf16.mxu1 %v459_v7 }
 0x314   :  { %462 = vmatpush1.bf16.msra.mxu1 %v461_v11 }
 0x315   :  { %353 = vmatprep.subr.mxu1 %v326_v13 }
 0x318   :  { %354 = vmatpush1.msra.mxu1 %v325_v15 }
 0x319   :  { %430 = vmatmul.mubr.msk.f32.vlgmr.msra.gmra.mrb[0].mxu1 %vm188_vm0, %v327_v14 }
 0x31e   :  { %v332_v16 = vpop.permute.xlu1 %331 }
 0x3ec   :  { %v403_v17 = vpop.f32.mrb[0].mxu1 }
 0x3ed   :  { %v404_v18 = vadd.f32 %v403_v17, %v332_v16  ;;  %v405_v19 = vpop.f32.mrb[1].mxu1 }
 0x3ee   :  { %v406_v20 = vadd.f32 %v405_v19, %v332_v16 }
 0x3ef   :  { %v408_v21 = vmax.f32 %v404_v18, 0.0 }
 0x3f0   :  { %v409_v22 = vmax.f32 %v406_v20, 0.0 }
 0x3f1   :  { %410 = vst [vmem:[#allocation6] sm:$0xff] %v408_v21 }
 0x3f2   :  { %411 = vst [vmem:[#allocation6 + $0x8] sm:$0xff] %v409_v22 }
 0x3f3   :  { %589 = shalt.err (!%p586_p12)
}
 0x3f4   :  { %s590_s15 = scalar_lea.hbm %s834_s7, 256 }
 0x3f5   :  { %p591_p13 = scmp.ne.s32.totalorder %s834_s7, %s590_s15  ;;  %p594_p0 = scmp.lt.u32.totalorder %s590_s15, %s834_s7 }
 0x3f7   :  { %p596_p1 = pnand %p594_p0, %p591_p13 }
 0x3f9   :  { %599 = shalt.err (!%p596_p1)
}
 0x3fa   :  { %s623_s0 = smov 128   ;;  %s624_s1 = smov 8  }
 0x3fb   :  { %423 = dma.vmem_to_hbm [thread:$0]  %s418_s12, 256, %s834_s7, [#allocation5], %s623_s0, %s623_s0, %s624_s1  }
 0x3fc   :  { %602 = dma.done.wait [#allocation5], 256  }
 0x3fd   :  { %603 = vsyncadd [#allocation5], 4294967040 }
 0x3fe   :  { %427 = vsyncpa [#allocation4], 1 }
 0x3ff   :  { %428 = vsyncpa [#allocation5], 1 }

</bundles_post_ra>
